<compile_context>
chip_gen: v6e
topology: v6e:2x2x1
jax: 0.10.0
libtpu: 0.0.40
codegen_flags: <defaults>
</compile_context>

<pallas_src>
import jax
import jax.numpy as jnp
from jax.experimental import pallas as pl
from jax.experimental.pallas import tpu as pltpu

# Stand-ins for cfg.IN_MOL_DIM, cfg.NODE_DIM, cfg.EMB_DIM (small, TPU-friendly).
IN_MOL_DIM = 16
NODE_DIM = 32
EMB_DIM = 64

# Row tile measured in *pair rows* (each pair row = 2 node rows packed to 128
# lanes).  512 pair rows == 1024 node rows per grid step: large enough to
# amortize the ~0.35us/step overhead (85%+ of HBM roofline on v6e), small
# enough that realistic graphs still give >=4 parallel steps for v7x's 2 TCs.
ROW_TILE_PAIRS = 512


def _linear_kernel(x_ref, w_ref, b_ref, o_ref):
    # x: (TM, Din), w: (Din, Dout), b: (1, Dout) -> o: (TM, Dout); f32 accumulate.
    acc = jnp.dot(x_ref[...], w_ref[...], preferred_element_type=jnp.float32)
    o_ref[...] = (acc + b_ref[...]).astype(o_ref.dtype)


def pallas_node_linear(x, w_packed, b_packed, *, tm=ROW_TILE_PAIRS):
    """y = x @ W.T + b for the node features, via the lane-dense paired kernel.

    w_packed: (2*Din, 2*Dout) block-diagonal [[W.T, 0], [0, W.T]]
    b_packed: (1, 2*Dout) = [b | b]
    """
    n, din = x.shape
    din2, dout2 = w_packed.shape
    dout = dout2 // 2

    if n == 0:  # empty batch: avoid a zero-size grid
        return jnp.zeros((0, dout), x.dtype)

    # Pair consecutive rows so each output row is 128 lanes wide.  Only pad a
    # single row when n is odd (static-shape decision; no full-array copy).
    n_even = n + (n % 2)
    if n_even != n:
        x = jnp.pad(x, ((0, 1), (0, 0)))
    rows2 = n_even // 2
    x2 = x.reshape(rows2, din2)  # free row-major view

    # Clamp the tile for tiny inputs; keep it sublane (8) aligned.
    tm_eff = max(8, min(tm, ((rows2 + 7) // 8) * 8))
    grid = (pl.cdiv(rows2, tm_eff),)  # ragged last tile handled by Pallas

    out2 = pl.pallas_call(
        _linear_kernel,
        out_shape=jax.ShapeDtypeStruct((rows2, dout2), x.dtype),
        grid=grid,
        in_specs=[
            pl.BlockSpec((tm_eff, din2), lambda i: (i, 0)),   # activation row tile
            pl.BlockSpec((din2, dout2), lambda i: (0, 0)),    # packed weight, resident
            pl.BlockSpec((1, dout2), lambda i: (0, 0)),       # packed bias row
        ],
        out_specs=pl.BlockSpec((tm_eff, dout2), lambda i: (i, 0)),  # 128-lane dense
        compiler_params=pltpu.CompilerParams(dimension_semantics=("parallel",)),
    )(x2, w_packed, b_packed)

    out = out2.reshape(n_even, dout)  # free row-major view back to (rows, EMB_DIM)
    return out if n_even == n else out[:n]


def _init_linear(key, din, dout, dtype=jnp.float32):
    """Deterministic init mimicking torch.nn.Linear defaults: U(-k, k), k = 1/sqrt(din)."""
    kw, kb = jax.random.split(key)
    bound = 1.0 / jnp.sqrt(jnp.asarray(din, dtype))
    w = jax.random.uniform(kw, (dout, din), dtype, minval=-bound, maxval=bound)
    b = jax.random.uniform(kb, (dout,), dtype, minval=-bound, maxval=bound)
    return w, b


def _pack_lane_dense(w_t, b):
    """Build block-diag [[W_t,0],[0,W_t]] (2Din,2Dout) and [b|b] (1,2Dout)."""
    z = jnp.zeros_like(w_t)
    top = jnp.concatenate([w_t, z], axis=1)
    bot = jnp.concatenate([z, w_t], axis=1)
    w2 = jnp.concatenate([top, bot], axis=0)
    b2 = jnp.concatenate([b, b]).reshape(1, -1)
    return w2, b2


def init_feature_embedder(key):
    ku, kx = jax.random.split(key)
    u_w, u_b = _init_linear(ku, IN_MOL_DIM, EMB_DIM)  # mlp_u_emb (torch layout)
    x_w, x_b = _init_linear(kx, NODE_DIM, EMB_DIM)    # mlp_x_emb (torch layout)
    # Layout transforms hoisted out of the forward path (perf review):
    u_wt = u_w.T                                       # (IN_MOL_DIM, EMB_DIM)
    x_w_packed, x_b_packed = _pack_lane_dense(x_w.T, x_b)  # (64,128), (1,128)
    return {
        "u_w": u_w, "u_b": u_b, "x_w": x_w, "x_b": x_b,     # natural (torch) params
        "u_wt": u_wt,                                        # pre-transposed
        "x_w_packed": x_w_packed, "x_b_packed": x_b_packed,  # lane-dense packed
    }


def feature_embedder_forward(params, batch):
    """batch is a dict with 'u' (num_graphs, IN_MOL_DIM) and 'x' (num_nodes, NODE_DIM)."""
    # Tiny per-graph projection: plain dot (a dedicated kernel launch would be
    # pure overhead for a few-hundred-FLOP matmul).
    u = batch["u"] @ params["u_wt"] + params["u_b"]
    # Hot path: node projection via the Pallas kernel.
    x = pallas_node_linear(batch["x"], params["x_w_packed"], params["x_b_packed"])
    return {**batch, "u": u, "x": x}


if __name__ == "__main__":
    key = jax.random.PRNGKey(0)
    k_params, k_u, k_x, k_x2 = jax.random.split(key, 4)

    params = init_feature_embedder(k_params)

    num_graphs, num_nodes = 2, 8
    batch = {
        "u": jax.random.normal(k_u, (num_graphs, IN_MOL_DIM), jnp.float32),
        "x": jax.random.normal(k_x, (num_nodes, NODE_DIM), jnp.float32),
    }

    out = feature_embedder_forward(params, batch)
    out = jax.tree_util.tree_map(jax.block_until_ready, out)

    # Pure-JAX reference check against the natural (torch-layout) parameters.
    ref_u = batch["u"] @ params["u_w"].T + params["u_b"]
    ref_x = batch["x"] @ params["x_w"].T + params["x_b"]
    assert out["u"].shape == (num_graphs, EMB_DIM)
    assert out["x"].shape == (num_nodes, EMB_DIM)
    assert jnp.allclose(out["u"], ref_u, atol=1e-4, rtol=1e-4)
    assert jnp.allclose(out["x"], ref_x, atol=1e-4, rtol=1e-4)

    # Extra check: odd node count + multiple grid steps + ragged last tile.
    x_big = jax.random.normal(k_x2, (1027, NODE_DIM), jnp.float32)
    y_big = jax.block_until_ready(
        pallas_node_linear(x_big, params["x_w_packed"], params["x_b_packed"]))
    ref_big = x_big @ params["x_w"].T + params["x_b"]
    assert y_big.shape == (1027, EMB_DIM)
    assert jnp.allclose(y_big, ref_big, atol=1e-4, rtol=1e-4)

    print("KERNEL_OK")
</pallas_src>

<mosaic_0001>
module attributes {stable_mosaic.version = 11 : i64} {
  func.func @_linear_kernel(%arg0: i32, %arg1: memref<8x64xf32, #tpu.memory_space<vmem>>, %arg2: memref<64x128xf32, #tpu.memory_space<vmem>>, %arg3: memref<1x128xf32, #tpu.memory_space<vmem>>, %arg4: memref<8x128xf32, #tpu.memory_space<vmem>>) attributes {dimension_semantics = [#tpu.dimension_semantics<parallel>], iteration_bounds = array<i64: 1>, scalar_prefetch = 0 : i64, scratch_operands = 0 : i64, tpu.core_type = #tpu.core_type<tc>, window_params = [{transform_indices = @transform_0, window_bounds = array<i64: 8, 64>}, {pipeline_mode = #tpu.pipeline_mode<synchronous>, transform_indices = @transform_1, window_bounds = array<i64: 64, 128>}, {pipeline_mode = #tpu.pipeline_mode<synchronous>, transform_indices = @transform_2, window_bounds = array<i64: 1, 128>}, {transform_indices = @transform_3, window_bounds = array<i64: 8, 128>}]} {
    %c0 = arith.constant 0 : index
    %c0_0 = arith.constant 0 : index
    %0 = vector.load %arg1[%c0, %c0_0] : memref<8x64xf32, #tpu.memory_space<vmem>>, vector<8x64xf32>
    %c0_1 = arith.constant 0 : index
    %c0_2 = arith.constant 0 : index
    %1 = vector.load %arg2[%c0_1, %c0_2] : memref<64x128xf32, #tpu.memory_space<vmem>>, vector<64x128xf32>
    %cst = arith.constant dense<0.000000e+00> : vector<8x128xf32>
    %2 = tpu.matmul %0, %1, %cst {dimension_numbers = #tpu.dot_dimension_numbers<[1], [0], [0], [1], [0, 0, 1, 1], [], []>} : vector<8x64xf32>, vector<64x128xf32>, vector<8x128xf32> -> vector<8x128xf32>
    %c0_3 = arith.constant 0 : index
    %c0_4 = arith.constant 0 : index
    %3 = vector.load %arg3[%c0_3, %c0_4] : memref<1x128xf32, #tpu.memory_space<vmem>>, vector<1x128xf32>
    %4 = vector.broadcast %3 : vector<1x128xf32> to vector<8x128xf32>
    %5 = arith.addf %2, %4 : vector<8x128xf32>
    %c0_5 = arith.constant 0 : index
    %c0_6 = arith.constant 0 : index
    %6 = vector.load %arg4[%c0_5, %c0_6] : memref<8x128xf32, #tpu.memory_space<vmem>>, vector<8x128xf32>
    tpu.vector_store %arg4[%c0_5, %c0_6], %5 {strides = array<i32>} : memref<8x128xf32, #tpu.memory_space<vmem>>, vector<8x128xf32>,
    return
  }
  func.func @transform_0(%arg0: i32) -> (i32, i32) {
    %c0_i32 = arith.constant 0 : i32
    %c0_i32_0 = arith.constant 0 : i32
    return %arg0, %c0_i32 : i32, i32
  }
  func.func @transform_1(%arg0: i32) -> (i32, i32) {
    %c0_i32 = arith.constant 0 : i32
    %c0_i32_0 = arith.constant 0 : i32
    %c0_i32_1 = arith.constant 0 : i32
    return %c0_i32, %c0_i32_0 : i32, i32
  }
  func.func @transform_2(%arg0: i32) -> (i32, i32) {
    %c0_i32 = arith.constant 0 : i32
    %c0_i32_0 = arith.constant 0 : i32
    %c0_i32_1 = arith.constant 0 : i32
    return %c0_i32, %c0_i32_0 : i32, i32
  }
  func.func @transform_3(%arg0: i32) -> (i32, i32) {
    %c0_i32 = arith.constant 0 : i32
    %c0_i32_0 = arith.constant 0 : i32
    return %arg0, %c0_i32 : i32, i32
  }
}

</mosaic_0001>

<bundles_post_ra>
// kernel: tpu_custom_call.1
= control target key start
LH: loop header
LB: loop body
LE: loop exit
PB: predicated region body
PF: predicated region fallthrough
CT: control target
= control target key end

     0   :  { %8 = vsyncpa [#allocation3], 0  ;;  %s304_s0 = inlined_call_operand.hbm [shape: f32[4,64], index: 0, kind: input, shape index: {}]   ;;  %s305_s1 = inlined_call_operand.hbm [shape: f32[64,128], index: 1, kind: input, shape index: {}]   ;;  %s306_s2 = inlined_call_operand.vmem [shape: f32[1,128], index: 2, kind: input, shape index: {}]   ;;  %s307_s3 = inlined_call_operand.hbm [shape: f32[4,128], index: 3, kind: output, shape index: {}]  }
   0x1   :  { %9 = vsyncpa [#allocation6], 0 }
   0x2   :  { %10 = vsyncpa [#allocation4], 0 }
   0x3   :  { %15 = vsyncadd [#allocation3], 64  ;;  %s257_s12 = smov [#allocation2]  }
   0x4   :  { %s16_s13 = sshll.u32 %s257_s12, 4  ;;  %s17_s13 = int_to_ptr.vmem [resolvable:$true] %s16_s13 }
   0x5   :  { %s199_s14 = scalar_lea.vmem %s17_s13, 64  ;;  %s203_s15 = scalar_lea.vmem %s17_s13, 128 }
   0x6   :  { %p200_p0 = scmp.ne.s32.totalorder %s17_s13, %s199_s14  ;;  %p204_p1 = scmp.lt.s32.totalorder %s17_s13, %s17_s13 }
   0x7   :  { %p205_p2 = scmp.lt.s32.totalorder %s203_s15, %s199_s14 }
   0x9   :  { %p206_p3 = por %p205_p2, %p204_p1 }
   0xb   :  { %p207_p4 = pnand %p206_p3, %p200_p0 }
   0xd   :  { %210 = shalt.err (!%p207_p4)
}
   0xe   :  { %s258_s16 = smov 64   ;;  %s259_s17 = smov 4  }
   0xf   :  { %22 = dma.hbm_to_vmem [thread:$0]  %s304_s0, 64, %s17_s13, [#allocation3], %s258_s16, %s258_s16, %s259_s17  }
  0x10   :  { %s260_s20 = smov [#allocation5]  }
  0x11   :  { %s28_s21 = sshll.u32 %s260_s20, 4  ;;  %s29_s21 = int_to_ptr.vmem [resolvable:$true] %s28_s21 }
  0x12   :  { %s219_s22 = scalar_lea.vmem %s29_s21, 1024  ;;  %p224_p6 = scmp.lt.s32.totalorder %s29_s21, %s29_s21 }
  0x13   :  { %p220_p5 = scmp.ne.s32.totalorder %s29_s21, %s219_s22  ;;  %p225_p7 = scmp.lt.s32.totalorder %s219_s22, %s219_s22 }
  0x15   :  { %p226_p8 = por %p225_p7, %p224_p6 }
  0x17   :  { %p227_p9 = pnand %p226_p8, %p220_p5 }
  0x19   :  { %230 = shalt.err (!%p227_p9)
}
  0x1a   :  { %s261_s23 = smov 128   ;;  %s262_s24 = smov 8  }
  0x1b   :  { %34 = dma.hbm_to_vmem [thread:$0]  %s305_s1, 1024, %s29_s21, [#allocation6], %s261_s23, %s261_s23, %s262_s24  }
  0x1c   :  { %251 = dma.done.wait [#allocation3], 128  }
  0x1d   :  { %252 = vsyncadd [#allocation3], 4294967168 }
  0x1e   :  { %253 = dma.done.wait [#allocation6], 1024  }
  0x1f   :  { %254 = vsyncadd [#allocation6], 4294966272  ;;  %v263_v0 = vmov 0.0   ;;  %vm264_vm0 = vmmov 0   ;;  %v51_v1 = vld [vmem:[#allocation5 + $0x38] sm:$0xff]  ;;  %v50_v2 = vld [vmem:[#allocation5 + $0x30] sm:$0xff] }
  0x20   :  { %163 = vmatprep.subr.mxu0 %v263_v0  ;;  %179 = vmatprep.mubr.msk.f32.mxu0 %vm264_vm0, %v263_v0  ;;  %v49_v3 = vld [vmem:[#allocation5 + $0x28] sm:$0xff]  ;;  %v48_v4 = vld [vmem:[#allocation5 + $0x20] sm:$0xff]  ;;  %v47_v5 = vld [vmem:[#allocation5 + $0x18] sm:$0xff]  ;;  %vm59_vm1 = vcmask 523264  }
  0x21   :  { %164 = vmatpush3.msra.mxu0 %v51_v1  ;;  %v46_v6 = vld [vmem:[#allocation5 + $0x10] sm:$0xff]  ;;  %v45_v7 = vld [vmem:[#allocation5 + $0x8] sm:$0xff]  ;;  %v44_v8 = vld [vmem:[#allocation5] sm:$0xff] }
  0x22   :  { %165 = vmatprep.subr.mxu0 %v263_v0  ;;  %v43_v9 = vld [vmem:[#allocation2] sm:$0xff] }
  0x23   :  { %166 = vmatpush3.msra.mxu0 %v50_v2  ;;  %v152_v10 = vld [vmem:[%s306_s2] ss:$0 sm:$0xff] }
  0x24   :  { %167 = vmatprep.subr.mxu0 %v263_v0 }
  0x25   :  { %168 = vmatpush3.msra.mxu0 %v49_v3 }
  0x26   :  { %169 = vmatprep.subr.mxu0 %v263_v0 }
  0x27   :  { %170 = vmatpush3.msra.mxu0 %v48_v4 }
  0x28   :  { %171 = vmatprep.subr.mxu0 %v263_v0 }
  0x29   :  { %172 = vmatpush3.msra.mxu0 %v47_v5 }
  0x2a   :  { %173 = vmatprep.subr.mxu0 %v263_v0 }
  0x2b   :  { %174 = vmatpush3.msra.mxu0 %v46_v6 }
  0x2c   :  { %175 = vmatprep.subr.mxu0 %v263_v0 }
  0x2d   :  { %176 = vmatpush3.msra.mxu0 %v45_v7 }
  0x2e   :  { %177 = vmatprep.subr.mxu0 %v263_v0 }
  0x2f   :  { %178 = vmatpush3.msra.mxu0 %v44_v8 }
  0x30   :  { %180 = vmatmul.mubr.msk.f32.vlgmr.msra.gmra.mxu0 %vm59_vm1, %v43_v9 }
  0xf0   :  { %v129_v11 = vpop.f32.mrf.mxu0 }
  0xf1   :  { %v130_v12 = vadd.f32 %v152_v10, %v129_v11 }
  0xf2   :  { %v181_v13 = vpop.f32.mrf.mxu0 }
  0xf3   :  { %133 = vst [vmem:[#allocation7] sm:$0xff] %v130_v12 }
  0xf4   :  { %138 = vsyncadd [#allocation4], 64  ;;  %s265_s27 = smov [#allocation7]  }
  0xf5   :  { %s139_s28 = sshll.u32 %s265_s27, 4  ;;  %s140_s28 = int_to_ptr.vmem [resolvable:$true] %s139_s28 }
  0xf6   :  { %s231_s29 = scalar_lea.vmem %s140_s28, 64  ;;  %s235_s30 = scalar_lea.vmem %s140_s28, 128 }
  0xf7   :  { %p232_p10 = scmp.ne.s32.totalorder %s140_s28, %s231_s29  ;;  %p236_p11 = scmp.lt.s32.totalorder %s140_s28, %s140_s28 }
  0xf8   :  { %p237_p12 = scmp.lt.s32.totalorder %s235_s30, %s231_s29 }
  0xfa   :  { %p238_p13 = por %p237_p12, %p236_p11 }
  0xfc   :  { %p239_p0 = pnand %p238_p13, %p232_p10 }
  0xfe   :  { %242 = shalt.err (!%p239_p0)
}
  0xff   :  { %145 = dma.vmem_to_hbm [thread:$0]  %s140_s28, 64, %s307_s3, [#allocation4], %s258_s16, %s258_s16, %s259_s17  }
 0x100   :  { %255 = dma.done.wait [#allocation4], 128  }
 0x101   :  { %256 = vsyncadd [#allocation4], 4294967168 }
 0x102   :  { %149 = vsyncpa [#allocation3], 1 }
 0x103   :  { %150 = vsyncpa [#allocation6], 1 }
 0x104   :  { %151 = vsyncpa [#allocation4], 1 }

</bundles_post_ra>
